<compile_context>
chip_gen: v7x
topology: tpu7x:2x2x1
jax: 0.10.0
libtpu: 0.0.40
codegen_flags: <defaults>
</compile_context>

<pallas_src>
import functools
import numpy as np

import jax
import jax.numpy as jnp
from jax import lax
from jax.experimental import pallas as pl
from jax.experimental.pallas import tpu as pltpu


def _ceil_div(a: int, b: int) -> int:
    return -(-a // b)


def _hann_1d(filter_size: int):
    """1-D separable factor of the L2pooling filter, as Python floats.

    PyTorch builds g = outer(a, a) / sum(outer(a, a)) with a = hanning(fs)[1:-1].
    Since sum(outer(a, a)) == sum(a)**2, g factors exactly as w ⊗ w with
    w = a / sum(a).  For filter_size=5, w = [0.25, 0.5, 0.25] exactly.
    """
    a = np.hanning(filter_size)[1:-1]
    w = a / a.sum()
    return tuple(float(v) for v in w)


def _vertical_tap_plan(H, Ho, k, pad, stride, w1d):
    """Static plan for the vertical (H-axis) pass when stride >= 2.

    Output row `oh` reads input row `stride*oh + dh - pad` for tap dh; rows
    outside [0, H) contribute zero (the conv's zero padding).  Everything is
    static Python, so the kernel has no dynamic boundary logic.  Returns
    (src_start_row, n_valid_rows, dst_start_row, weight), centre tap first
    (it always covers every output row, so it initializes the vreg sum with
    no zero-padding concat).
    """
    taps = []
    for dh in range(k):
        off = dh - pad
        oh_min = max(0, _ceil_div(-off, stride))
        oh_max = min(Ho - 1, (H - 1 - off) // stride)
        if oh_max < oh_min:
            continue
        n = oh_max - oh_min + 1
        src = stride * oh_min + off
        taps.append((src, n, oh_min, float(w1d[dh]), dh == pad))
    taps.sort(key=lambda t: not t[4])                 # centre tap first
    return tuple((s, n, d, w) for (s, n, d, w, _) in taps)


def _horizontal_band_matrix(W, Wo, k, pad, stride, w1d):
    """(W, Wo) banded matrix folding the W-axis taps, zero padding and stride."""
    B = np.zeros((W, Wo), dtype=np.float32)
    for ow in range(Wo):
        for dw in range(k):
            w = stride * ow + dw - pad
            if 0 <= w < W:
                B[w, ow] += w1d[dw]
    return B


# ----------------------------------------------------------------------------
# Kernels
# ----------------------------------------------------------------------------

def _l2pool_kernel_s1(x_ref, o_ref, *, k, pad, w1d, eps):
    """stride == 1: square once, separable taps as static slices + FMAs.

    x_ref: (tc, H, W) input tile (native dtype); o_ref: (tc, H, W) output.
    No scratch, no partial stores: everything is accumulated in vregs and
    o_ref is written exactly once.
    """
    tc, H, W = x_ref.shape
    x = x_ref[...].astype(jnp.float32)
    xsq = x * x                                           # square ONCE per tile

    # Vertical (H) pass: zero-pad the sublane axis, then k offset slices.
    if pad > 0:
        zr = jnp.zeros((tc, pad, W), jnp.float32)
        xp = jnp.concatenate([zr, xsq, zr], axis=1)       # (tc, H+2*pad, W)
    else:
        xp = xsq
    v = None
    for dh in range(k):
        term = w1d[dh] * xp[:, dh:dh + H, :]
        v = term if v is None else v + term

    # Horizontal (W) pass: same trick on the lane axis (no MXU for stride 1).
    if pad > 0:
        zc = jnp.zeros((tc, H, pad), jnp.float32)
        vp = jnp.concatenate([zc, v, zc], axis=2)         # (tc, H, W+2*pad)
    else:
        vp = v
    out = None
    for dw in range(k):
        term = w1d[dw] * vp[:, :, dw:dw + W]
        out = term if out is None else out + term

    o_ref[...] = jnp.sqrt(out + eps).astype(o_ref.dtype)


def _l2pool_kernel_strided(x_ref, bh_ref, o_ref, *, taps, stride, Ho_pad, eps):
    """stride >= 2: vertical taps via strided ref reads summed in vregs,
    horizontal taps + W-pad + W-stride folded into one constant band matmul.

    x_ref : (tc, H, W) input tile (native dtype)
    bh_ref: (W, Wo)    constant banded matrix (resident: constant index map)
    o_ref : (tc, Ho, Wo)
    """
    tc, _, W = x_ref.shape
    Ho = o_ref.shape[1]
    Wo = o_ref.shape[2]

    # ---- Vertical (H) pass, accumulated in vregs (single final write). ----
    v = None
    for (src, n, dst, w_tap) in taps:
        rows = x_ref[:, pl.ds(src, n, stride), :].astype(jnp.float32)
        contrib = w_tap * (rows * rows)                   # (tc, n, W)
        if n != Ho:
            # boundary tap: pad to full Ho rows with zeros (conv zero-padding)
            parts = []
            if dst > 0:
                parts.append(jnp.zeros((tc, dst, W), jnp.float32))
            parts.append(contrib)
            if dst + n < Ho:
                parts.append(jnp.zeros((tc, Ho - dst - n, W), jnp.float32))
            contrib = jnp.concatenate(parts, axis=1)
        v = contrib if v is None else v + contrib

    # ---- Horizontal (W) pass on the MXU. Keep the (tc, Ho, W)->(tc*Ho_pad, W)
    # ---- reshape layout-free by padding Ho up to a multiple of 8 first.
    if Ho_pad != Ho:
        v = jnp.concatenate(
            [v, jnp.zeros((tc, Ho_pad - Ho, W), jnp.float32)], axis=1)
    out = jnp.dot(v.reshape(tc * Ho_pad, W), bh_ref[...],
                  preferred_element_type=jnp.float32)     # (tc*Ho_pad, Wo)
    out = out.reshape(tc, Ho_pad, Wo)
    if Ho_pad != Ho:
        out = out[:, :Ho, :]

    o_ref[...] = jnp.sqrt(out + eps).astype(o_ref.dtype)


# ----------------------------------------------------------------------------
# Wrapper
# ----------------------------------------------------------------------------

def _vmem_capacity_bytes() -> int:
    try:
        info = pltpu.get_tpu_info()
        for attr in ("vmem_capacity_bytes", "vmem_size_bytes"):
            cap = getattr(info, attr, None)
            if cap:
                return int(cap)
    except Exception:
        pass
    return 64 * 1024 * 1024          # conservative default (v7x-sized)


def l2pooling(x_nchw: jnp.ndarray, filter_size: int = 5, stride: int = 1) -> jnp.ndarray:
    """Pallas implementation of L2pooling.forward.  Input/output are NCHW."""
    assert filter_size % 2 == 1, "filter_size must be odd to match PyTorch padding"
    N, C, H, W = x_nchw.shape
    k = filter_size - 2
    pad = (filter_size - 2) // 2
    s = int(stride)
    Ho = (H + 2 * pad - k) // s + 1
    Wo = (W + 2 * pad - k) // s + 1
    Ho_pad = Ho if Ho % 8 == 0 else _ceil_div(Ho, 8) * 8
    w1d = _hann_1d(filter_size)

    # ---- Per-generation tile & scoped-VMEM budget (v5e/v6e: 128 MiB physical,
    # ---- bigger tiles / fewer steps; v7x: 64 MiB, tighter cap, >=8 steps/TC).
    vmem_cap = _vmem_capacity_bytes()
    big_vmem = vmem_cap >= 100 * 1024 * 1024
    in_tile_target = (6 if big_vmem else 3) * 1024 * 1024
    scoped_cap = (96 if big_vmem else 40) * 1024 * 1024
    min_steps = 8 if big_vmem else 16        # ~8 steps/TensorCore (v7x has 2)

    itemsize = jnp.dtype(x_nchw.dtype).itemsize

    def vmem_need(tc_):
        in_tile = tc_ * H * W * itemsize
        out_tile = tc_ * Ho * Wo * itemsize
        bh_tile = W * Wo * 4 if s > 1 else 0
        # generous bound on live f32 value temporaries inside the body
        tmp = 4 * tc_ * ((H + 2 * pad) * W + 2 * Ho_pad * W
                         + Ho * (W + 2 * pad) + Ho_pad * Wo)
        return 2 * (in_tile + out_tile + bh_tile) + tmp   # 2x = double-buffered IO

    tc = max(1, min(C, in_tile_target // max(H * W * itemsize, 1)))
    # keep enough grid steps for pipeline ramp-up + megacore sharding
    c_blocks = max(1, min(C, _ceil_div(min_steps, N)))
    tc = min(tc, _ceil_div(C, c_blocks))
    # prefer tc | C so the trailing channel block isn't ragged (a ragged block
    # reads OOB channels; harmless — the masked writeback drops them — but a
    # divisor keeps every grid step uniform)
    best_div = max((d for d in range(1, tc + 1) if C % d == 0), default=1)
    if 2 * best_div >= tc:
        tc = best_div
    while tc > 1 and vmem_need(tc) > (3 * scoped_cap) // 4:
        tc = max(1, tc // 2)

    vmem_limit = int(min(max(vmem_need(tc) * 5 // 4, 32 * 1024 * 1024), scoped_cap))

    grid = (N, _ceil_div(C, tc))
    x_spec = pl.BlockSpec((None, tc, H, W), lambda n, c: (n, c, 0, 0))
    o_spec = pl.BlockSpec((None, tc, Ho, Wo), lambda n, c: (n, c, 0, 0))
    out_shape = jax.ShapeDtypeStruct((N, C, Ho, Wo), x_nchw.dtype)
    cparams = pltpu.CompilerParams(
        dimension_semantics=("parallel", "parallel"),
        vmem_limit_bytes=vmem_limit,
    )

    if s == 1:
        assert Ho == H and Wo == W
        kernel = functools.partial(_l2pool_kernel_s1,
                                   k=k, pad=pad, w1d=w1d, eps=1e-12)
        return pl.pallas_call(
            kernel,
            out_shape=out_shape,
            grid=grid,
            in_specs=[x_spec],
            out_specs=o_spec,
            compiler_params=cparams,
        )(x_nchw)

    taps = _vertical_tap_plan(H, Ho, k, pad, s, w1d)
    bh = jnp.asarray(_horizontal_band_matrix(W, Wo, k, pad, s, w1d))
    # bh has a constant index map -> Pallas does not re-DMA it when the block
    # index is unchanged between consecutive grid steps (stays resident).
    bh_spec = pl.BlockSpec((W, Wo), lambda n, c: (0, 0))
    kernel = functools.partial(_l2pool_kernel_strided,
                               taps=taps, stride=s, Ho_pad=Ho_pad, eps=1e-12)
    return pl.pallas_call(
        kernel,
        out_shape=out_shape,
        grid=grid,
        in_specs=[x_spec, bh_spec],
        out_specs=o_spec,
        compiler_params=cparams,
    )(x_nchw, bh)


# ----------------------------------------------------------------------------
# Pure-JAX reference (mirrors F.conv2d with groups=C)
# ----------------------------------------------------------------------------

def l2pooling_ref(x_nchw: jnp.ndarray, filter_size: int = 5, stride: int = 1) -> jnp.ndarray:
    C = x_nchw.shape[1]
    pad = (filter_size - 2) // 2
    a = np.hanning(filter_size)[1:-1]
    g = a[:, None] * a[None, :]
    g = g / g.sum()
    w = jnp.tile(jnp.asarray(g, jnp.float32)[None, None, :, :], (C, 1, 1, 1))
    out = lax.conv_general_dilated(
        x_nchw.astype(jnp.float32) ** 2, w,
        window_strides=(stride, stride),
        padding=((pad, pad), (pad, pad)),
        dimension_numbers=("NCHW", "OIHW", "NCHW"),
        feature_group_count=C,
        precision=lax.Precision.HIGHEST)
    return jnp.sqrt(out + 1e-12).astype(x_nchw.dtype)


if __name__ == "__main__":
    key = jax.random.PRNGKey(0)
    x = jax.random.normal(key, (2, 4, 16, 16), dtype=jnp.float32)   # NCHW

    # stride=1 (module default): pure VPU/XLU separable path
    y1 = jax.block_until_ready(l2pooling(x, filter_size=5, stride=1))
    r1 = l2pooling_ref(x, filter_size=5, stride=1)
    assert y1.shape == r1.shape, (y1.shape, r1.shape)
    assert jnp.allclose(y1, r1, rtol=1e-4, atol=1e-4), float(jnp.max(jnp.abs(y1 - r1)))

    # stride=2 (DISTS-style): strided taps + band-matrix MXU path, Ho % 8 == 0
    y2 = jax.block_until_ready(l2pooling(x, filter_size=5, stride=2))
    r2 = l2pooling_ref(x, filter_size=5, stride=2)
    assert y2.shape == r2.shape, (y2.shape, r2.shape)
    assert jnp.allclose(y2, r2, rtol=1e-4, atol=1e-4), float(jnp.max(jnp.abs(y2 - r2)))

    # stride=2 with Ho % 8 != 0 (12x12 -> 6x6): exercises the 8-aligned
    # sublane zero-pad before the layout-free reshape + matmul.
    x3 = jax.random.normal(jax.random.PRNGKey(0), (1, 3, 12, 12), dtype=jnp.float32)
    y3 = jax.block_until_ready(l2pooling(x3, filter_size=5, stride=2))
    r3 = l2pooling_ref(x3, filter_size=5, stride=2)
    assert y3.shape == r3.shape, (y3.shape, r3.shape)
    assert jnp.allclose(y3, r3, rtol=1e-4, atol=1e-4), float(jnp.max(jnp.abs(y3 - r3)))

    print("KERNEL_OK")
</pallas_src>

<mosaic_0001>
module attributes {stable_mosaic.version = 11 : i64} {
  func.func @_l2pool_kernel_s1(%arg0: i32, %arg1: i32, %arg2: memref<1x1x16x16xf32, #tpu.memory_space<vmem>>, %arg3: memref<1x1x16x16xf32, #tpu.memory_space<vmem>>) attributes {dimension_semantics = [#tpu.dimension_semantics<parallel>, #tpu.dimension_semantics<parallel>], iteration_bounds = array<i64: 2, 4>, scalar_prefetch = 0 : i64, scratch_operands = 0 : i64, tpu.core_type = #tpu.core_type<tc>, window_params = [{transform_indices = @transform_0, window_bounds = array<i64: 1, 1, 16, 16>}, {transform_indices = @transform_1, window_bounds = array<i64: 1, 1, 16, 16>}]} {
    %c0 = arith.constant 0 : index
    %c0_0 = arith.constant 0 : index
    %c0_1 = arith.constant 0 : index
    %c0_2 = arith.constant 0 : index
    %0 = vector.load %arg2[%c0, %c0_0, %c0_1, %c0_2] : memref<1x1x16x16xf32, #tpu.memory_space<vmem>>, vector<1x1x16x16xf32>
    %1 = vector.shape_cast %0 : vector<1x1x16x16xf32> to vector<1x16x16xf32>
    %2 = arith.mulf %1, %1 : vector<1x16x16xf32>
    %cst = arith.constant 0.000000e+00 : f32
    %3 = vector.broadcast %cst : f32 to vector<1x1x16xf32>
    %4 = tpu.concatenate %3, %2, %3 in 1 : vector<1x1x16xf32>, vector<1x16x16xf32>, vector<1x1x16xf32> -> vector<1x18x16xf32>
    %5 = vector.extract_strided_slice %4 {offsets = [0, 0, 0], sizes = [1, 16, 16], strides = [1, 1, 1]} : vector<1x18x16xf32> to vector<1x16x16xf32>
    %cst_3 = arith.constant 2.500000e-01 : f32
    %6 = vector.broadcast %cst_3 : f32 to vector<1x16x16xf32>
    %7 = arith.mulf %6, %5 : vector<1x16x16xf32>
    %8 = vector.extract_strided_slice %4 {offsets = [0, 1, 0], sizes = [1, 16, 16], strides = [1, 1, 1]} : vector<1x18x16xf32> to vector<1x16x16xf32>
    %cst_4 = arith.constant 5.000000e-01 : f32
    %9 = vector.broadcast %cst_4 : f32 to vector<1x16x16xf32>
    %10 = arith.mulf %9, %8 : vector<1x16x16xf32>
    %11 = arith.addf %7, %10 : vector<1x16x16xf32>
    %12 = vector.extract_strided_slice %4 {offsets = [0, 2, 0], sizes = [1, 16, 16], strides = [1, 1, 1]} : vector<1x18x16xf32> to vector<1x16x16xf32>
    %cst_5 = arith.constant 2.500000e-01 : f32
    %13 = vector.broadcast %cst_5 : f32 to vector<1x16x16xf32>
    %14 = arith.mulf %13, %12 : vector<1x16x16xf32>
    %15 = arith.addf %11, %14 : vector<1x16x16xf32>
    %cst_6 = arith.constant 0.000000e+00 : f32
    %16 = vector.broadcast %cst_6 : f32 to vector<1x16x1xf32>
    %17 = tpu.concatenate %16, %15, %16 in 2 : vector<1x16x1xf32>, vector<1x16x16xf32>, vector<1x16x1xf32> -> vector<1x16x18xf32>
    %18 = vector.extract_strided_slice %17 {offsets = [0, 0, 0], sizes = [1, 16, 16], strides = [1, 1, 1]} : vector<1x16x18xf32> to vector<1x16x16xf32>
    %cst_7 = arith.constant 2.500000e-01 : f32
    %19 = vector.broadcast %cst_7 : f32 to vector<1x16x16xf32>
    %20 = arith.mulf %19, %18 : vector<1x16x16xf32>
    %21 = vector.extract_strided_slice %17 {offsets = [0, 0, 1], sizes = [1, 16, 16], strides = [1, 1, 1]} : vector<1x16x18xf32> to vector<1x16x16xf32>
    %cst_8 = arith.constant 5.000000e-01 : f32
    %22 = vector.broadcast %cst_8 : f32 to vector<1x16x16xf32>
    %23 = arith.mulf %22, %21 : vector<1x16x16xf32>
    %24 = arith.addf %20, %23 : vector<1x16x16xf32>
    %25 = vector.extract_strided_slice %17 {offsets = [0, 0, 2], sizes = [1, 16, 16], strides = [1, 1, 1]} : vector<1x16x18xf32> to vector<1x16x16xf32>
    %cst_9 = arith.constant 2.500000e-01 : f32
    %26 = vector.broadcast %cst_9 : f32 to vector<1x16x16xf32>
    %27 = arith.mulf %26, %25 : vector<1x16x16xf32>
    %28 = arith.addf %24, %27 : vector<1x16x16xf32>
    %cst_10 = arith.constant 9.99999996E-13 : f32
    %29 = vector.broadcast %cst_10 : f32 to vector<1x16x16xf32>
    %30 = arith.addf %28, %29 : vector<1x16x16xf32>
    %31 = math.sqrt %30 : vector<1x16x16xf32>
    %c0_11 = arith.constant 0 : index
    %c0_12 = arith.constant 0 : index
    %c0_13 = arith.constant 0 : index
    %c0_14 = arith.constant 0 : index
    %32 = vector.load %arg3[%c0_11, %c0_12, %c0_13, %c0_14] : memref<1x1x16x16xf32, #tpu.memory_space<vmem>>, vector<1x1x16x16xf32>
    %33 = vector.shape_cast %32 : vector<1x1x16x16xf32> to vector<1x16x16xf32>
    %34 = vector.shape_cast %31 : vector<1x16x16xf32> to vector<1x1x16x16xf32>
    tpu.vector_store %arg3[%c0_11, %c0_12, %c0_13, %c0_14], %34 {strides = array<i32>} : memref<1x1x16x16xf32, #tpu.memory_space<vmem>>, vector<1x1x16x16xf32>,
    return
  }
  func.func @transform_0(%arg0: i32, %arg1: i32) -> (i32, i32, i32, i32) {
    %c0_i32 = arith.constant 0 : i32
    %c0_i32_0 = arith.constant 0 : i32
    %c0_i32_1 = arith.constant 0 : i32
    return %arg0, %arg1, %c0_i32, %c0_i32_0 : i32, i32, i32, i32
  }
  func.func @transform_1(%arg0: i32, %arg1: i32) -> (i32, i32, i32, i32) {
    %c0_i32 = arith.constant 0 : i32
    %c0_i32_0 = arith.constant 0 : i32
    %c0_i32_1 = arith.constant 0 : i32
    return %arg0, %arg1, %c0_i32, %c0_i32_0 : i32, i32, i32, i32
  }
}

</mosaic_0001>

<bundles_post_ra>
// kernel: tpu_custom_call.1
= control target key start
LH: loop header
LB: loop body
LE: loop exit
PB: predicated region body
PF: predicated region fallthrough
CT: control target
= control target key end

     0   :  { %6 = vsyncpa [#allocation3], 0  ;;  %s819_s0 = inlined_call_operand.hbm [shape: f32[2,4,16,16], index: 0, kind: input, shape index: {}]   ;;  %s820_s1 = inlined_call_operand.hbm [shape: f32[2,4,16,16], index: 1, kind: output, shape index: {}]  }
   0x1   :  { %8 = vsyncpa [#allocation3 + $0x1], 0 }
   0x2   :  { %9 = vsyncpa [#allocation4], 0 }
   0x3   :  { %11 = vsyncpa [#allocation4 + $0x1], 0  ;;  %s618_s6 = smov 0   ;;  %s620_s7 = smov 0  }
   0x4   :  { %s622_s8 = smov 0   ;;  %s624_s9 = smov 0  }
   0x5   :  { %s626_s10 = smov 0   ;;  %s628_s11 = smov 0  }
   0x6   :  { %s630_s12 = smov 0   ;;  %s632_s13 = smov 0  }
   0x7 LB: > { %s363_s14 = sadd.s32 4294967295, %s597_s13   ;;  %s364_s15 = sadd.s32 4294967294, %s597_s13   ;;  %s597_s13 = sphi %s632_s13, %s17_s13   ;;  %s593_s12 = sphi %s630_s12, %s835_s12   ;;  %s589_s11 = sphi %s628_s11, %s834_s11   ;;  %s585_s10 = sphi %s626_s10, %s833_s10   ;;  %s581_s9 = sphi %s624_s9, %s832_s9   ;;  %s577_s8 = sphi %s622_s8, %s831_s8   ;;  %s573_s7 = sphi %s620_s7, %s830_s7   ;;  %s569_s6 = sphi %s618_s6, %s829_s6  }
   0x8   : > { %s26_s16 = sadd.s32 1, %s589_s11  ;;  %s29_s17 = sadd.s32 1, %s593_s12 }
   0x9   : > { %p27_p0 = scmp.ge.s32.totalorder %s26_s16, 4  ;;  %s38_s18 = sadd.s32 1, %s577_s8 }
   0xa   : > { %p45_p1 = scmp.ne.s32.totalorder %s577_s8, %s573_s7  ;;  %p46_p2 = scmp.eq.s32.totalorder %s597_s13, 0 }
   0xb   : > { %s837_s16 = smov (%p27_p0, %s26_s16), 0  ;;  %s839_s17 = smov (!%p27_p0, %s29_s17), %s593_s12 }
   0xc   : > { %s34_s19 = ssub.s32 %s589_s11, %s837_s16  ;;  %p671_p3 = por %p46_p2, %p45_p1 }
   0xd   : > { %p31_p4 = scmp.ge.s32.totalorder %s839_s17, 2  ;;  %p51_p5 = scmp.ne.s32.totalorder %s573_s7, %s569_s6 }
   0xe   : > { %p52_p6 = scmp.eq.s32.totalorder %s363_s14, 0  ;;  %p77_p7 = scmp.eq.s32.totalorder %s363_s14, 7 }
   0xf   : > { %s841_s17 = smov (%p31_p4, %s839_s17), 0  ;;  %p83_p10 = scmp.eq.s32.totalorder %s364_s15, 7 }
  0x10   : > { %p679_p8 = por %p52_p6, %p51_p5  ;;  %p683_p9 = por %p77_p7, %p45_p1 }
  0x11   : > { %s33_s23 = ssub.s32 %s593_s12, %s841_s17  ;;  %p689_p12 = por %p83_p10, %p51_p5 }
  0x12   : > { %s824_s22 = scalar_select %p683_p9, 1, 0 }
  0x13   : > { %s35_s24 = sor.u32 %s34_s19, %s33_s23  ;;  %p392_p13 = scmp.lt.s32.totalorder %s597_s13, 8 }
  0x14   : > { %p36_p11 = scmp.eq.s32.totalorder %s35_s24, 0  ;;  %s103_s26 = sand.u32 1, %s577_s8  }
  0x15   : > { %s825_s25 = scalar_select %p689_p12, 1, 0 }
  0x16   : > { %s696_s27 = scalar_select %p36_p11, %s577_s8, %s38_s18  }
  0x17   : > { %s367_s28 = sshll.u32 %s103_s26, 4  ;;  %s368_s29 = sshll.u32 %s589_s11, 1 }
  0x18   : > { %s369_s30 = sshll.u32 %s593_s12, 3  ;;  %s107_s2 = scalar_lea.vmem [#allocation2], %s367_s28 }
  0x19   : > { %s116_s3 = sshll.u32 %s107_s2, 4  ;;  %s113_s4 = sadd.s32 %s369_s30, %s368_s29  ;;  %s700_s3 = int_to_ptr.vmem [resolvable:$true] %s116_s3 }
  0x1a   : > { %s370_s5 = sshll.u32 %s113_s4, 7  ;;  %p704_p0 = pnand %p392_p13, %p671_p3 }
  0x1b   : > { %s711_s18 = scalar_lea.hbm %s819_s0, %s370_s5  ;;  %s713_s23 = scalar_lea.sflag [#allocation3], %s103_s26 }
  0x1c   : > { %s469_s24 = scalar_lea.hbm %s711_s18, 256  ;;  %p471_p2 = pneg %p704_p0 }
  0x1d   : > { %p470_p1 = scmp.ne.s32.totalorder %s711_s18, %s469_s24  ;;  %s474_s29 = scalar_lea.hbm %s819_s0, 2048 }
  0x1e   : > { %p475_p5 = scmp.lt.u32.totalorder %s711_s18, %s819_s0  ;;  %p476_p6 = scmp.lt.u32.totalorder %s474_s29, %s469_s24 }
  0x1f   : > { %p472_p3 = pnand %p471_p2, %p470_p1  ;;  %p478_p10 = scmp.lt.u32.totalorder %s469_s24, %s711_s18 }
  0x20   : > { %p477_p7 = por %p476_p6, %p475_p5 }
  0x21   : > { %p473_p4 = pneg %p472_p3 }
  0x22   : > { %p479_p11 = por %p478_p10, %p477_p7 }
  0x24   : > { %p480_p13 = pnand %p479_p11, %p473_p4 }
  0x26   : > { %483 = shalt.err (!%p480_p13)
}
  0x27   : > { %s484_s26 = scalar_lea.vmem %s700_s3, 256  ;;  %s599_s4 = smov [#allocation2]  }
  0x28   : > { %p485_p1 = scmp.ne.s32.totalorder %s700_s3, %s484_s26  ;;  %s489_s5 = sshll.u32 %s599_s4, 4  ;;  %s490_s5 = int_to_ptr.vmem [resolvable:$false] %s489_s5 }
  0x29   : > { %s491_s15 = scalar_lea.vmem %s490_s5, 512  ;;  %p492_p9 = scmp.lt.s32.totalorder %s700_s3, %s490_s5 }
  0x2a   : > { %p487_p3 = pnand %p485_p1, %p471_p2  ;;  %p493_p5 = scmp.lt.s32.totalorder %s491_s15, %s484_s26 }
  0x2c   : > { %p488_p12 = pneg %p487_p3  ;;  %p494_p6 = por %p493_p5, %p492_p9 }
  0x2e   : > { %p495_p7 = pnand %p494_p6, %p488_p12 }
  0x30   : > { %498 = shalt.err (!%p495_p7)
}
  0x31   : > { %s600_s19 = smov 128   ;;  %s601_s24 = smov 8  }
  0x32   : > { %387 = dma.hbm_to_vmem [thread:$0]  (!%p704_p0), %s711_s18, 256, %s700_s3, %s713_s23, %s600_s19, %s600_s19, %s601_s24  }
  0x33   : > { %p371_p2 = scmp.ge.s32.totalorder %s597_s13, 1  ;;  %p124_p4 = scmp.lt.s32.totalorder %s597_s13, 9 }
  0x35   : > { %p125_p10 = pnand %p371_p2, %p124_p4 }
  0x36   : > { %s744_s20 = sand.u32 (!%p125_p10), 1, %s573_s7  }
  0x37   : > { %128 = sbr.rel (%p125_p10) target bundleno = 354 (0x162), region = 24  ;;  %s372_s28 = sshll.u32 (!%p125_p10), %s744_s20, 4 }
  0x38   : > { %s131_s29 = scalar_lea.sflag (!%p125_p10), [#allocation3], %s744_s20  ;;  %s134_s30 = scalar_lea.vmem (!%p125_p10), [#allocation2], %s372_s28 }
  0x3e   : > { %560 = dma.done.wait (%p679_p8), %s131_s29, 256  }
  0x3f   : > { %562 = vsyncadd (%p679_p8), %s131_s29, 4294967040  ;;  %v153_v0 = vld [vmem:[%s134_s30] sm:$0xff]  ;;  %v154_v1 = vld [vmem:[%s134_s30 + $0x8] sm:$0xff]  ;;  %vm159_vm0 = vcmask 1040384   ;;  %vm176_vm1 = vcmask 1046528   ;;  %vm190_vm2 = vcmask 1045504  }
  0x40   : > { %v155_v2 = vmul.f32 %v153_v0, %v153_v0  ;;  %v156_v3 = vmul.f32 %v154_v1, %v154_v1  ;;  %s602_s21 = smov 1   ;;  %vm208_vm3 = vcmask 7168   ;;  %vm211_vm4 = vcmask 138240   ;;  %s603_s3 = smov 127  }
  0x41   : > { %s604_s14 = smov 126   ;;  %s375_s18 = sshll.u32 %s581_s9, 1  ;;  %vm254_vm6 = vcmask 130048  }
  0x42   : > { %v160_v4 = vrot.slane %v155_v2, 7  ;;  %v161_v5 = vrot.slane %v156_v3, 7  ;;  %s376_s23 = sshll.u32 %s585_s10, 3  ;;  %s152_s26 = scalar_lea.vmem [#allocation5], %s372_s28 }
  0x43   : > { %s270_s2 = sadd.s32 %s376_s23, %s375_s18  ;;  %s273_s5 = sshll.u32 %s152_s26, 4  ;;  %s764_s5 = int_to_ptr.vmem [resolvable:$true] %s273_s5 }
  0x44   : > { %v162_v6 = vsel %vm159_vm0, %v160_v4, %v161_v5  ;;  %v166_v7 = vsel %vm159_vm0, 0.0, %v160_v4  ;;  %v167_v8 = vsel %vm159_vm0, %v161_v5, 0.0  ;;  %s377_s4 = sshll.u32 %s270_s2, 7  ;;  %s258_s19 = scalar_lea.sflag [#allocation4], %s744_s20 }
  0x45   : > { %v168_v9 = vmul.f32 0.25, %v166_v7  ;;  %v169_v10 = vmul.f32 0.25, %v162_v6  ;;  %v170_v11 = vmul.f32 0.5, %v166_v7  ;;  %v171_v12 = vmul.f32 0.5, %v162_v6  ;;  %s762_s15 = scalar_lea.hbm %s820_s1, %s377_s4  ;;  %s499_s24 = scalar_lea.vmem %s764_s5, 256 }
  0x46   : > { %v172_v13 = vmul.f32 0.5, %v167_v8  ;;  %v186_v14 = vmul.f32 0.25, %v167_v8  ;;  %p500_p8 = scmp.ne.s32.totalorder %s764_s5, %s499_s24  ;;  %p827_p9 = scmp.ne.s32.totalorder %s824_s22, 0 }
  0x47   : > { %v177_v15 = vrot.slane %v170_v11, 1  ;;  %v178_v16 = vrot.slane %v171_v12, 1  ;;  %v191_v17 = vrot.slane %v168_v9, 2  ;;  %v192_v18 = vrot.slane %v169_v10, 2  ;;  %s605_s28 = smov [#allocation5]  }
  0x48   : > { %v180_v19 = vrot.slane %v172_v13, 1  ;;  %v194_v20 = vrot.slane %v186_v14, 2  ;;  %p501_p12 = pnand %p500_p8, %p827_p9  ;;  %s503_s29 = sshll.u32 %s605_s28, 4  ;;  %s504_s29 = int_to_ptr.vmem [resolvable:$false] %s503_s29 }
  0x49   : > { %v179_v21 = vsel %vm176_vm1, %v177_v15, %v178_v16  ;;  %v193_v22 = vsel %vm190_vm2, %v191_v17, %v192_v18  ;;  %s505_s30 = scalar_lea.vmem %s504_s29, 512  ;;  %p506_p11 = scmp.lt.s32.totalorder %s764_s5, %s504_s29 }
  0x4a   : > { %v184_v23 = vadd.f32 %v179_v21, %v168_v9  ;;  %v181_v24 = vsel %vm176_vm1, %v178_v16, %v180_v19  ;;  %v195_v26 = vsel %vm190_vm2, %v192_v18, %v194_v20  ;;  %p502_p0 = pneg %p501_p12  ;;  %p507_p13 = scmp.lt.s32.totalorder %s505_s30, %s499_s24 }
  0x4b   : > { %v185_v25 = vadd.f32 %v181_v24, %v169_v10 }
  0x4c   : > { %v198_v27 = vadd.f32 %v193_v22, %v184_v23  ;;  %p508_p1 = por %p507_p13, %p506_p11 }
  0x4d   : > { %v199_v28 = vadd.f32 %v195_v26, %v185_v25 }
  0x4e   : > { %202 = vrot.lane.b32.xlu0 %v198_v27, %s602_s21  ;;  %p509_p3 = pnand %p508_p1, %p502_p0 }
  0x52   : > { %204 = vrot.lane.b32.xlu0 %v199_v28, %s602_s21 }
  0xc0   : > { %v203_v29 = vpop.permute.xlu0 %202 }
  0xc1   : > { %v209_v30 = vsel %vm208_vm3, 0.0, %v203_v29 }
  0xc2   : > { %v212_v31 = vsel %vm211_vm4, %v209_v30, 0.0 }
  0xc3   : > { %v214_v32 = vmul.f32 0.25, %v212_v31  ;;  %v216_v33 = vmul.f32 0.5, %v212_v31 }
  0xc4   : > { %v205_v34 = vpop.permute.xlu0 %204 }
  0xc5   : > { %v210_v35 = vsel %vm208_vm3, 0.0, %v205_v34  ;;  %220 = vrot.lane.b32.xlu1 %v216_v33, %s603_s3  ;;  %230 = vrot.lane.b32.xlu0 %v214_v32, %s604_s14 }
  0xc6   : > { %v213_v36 = vsel %vm211_vm4, %v210_v35, 0.0 }
  0xc7   : > { %v217_v37 = vmul.f32 0.5, %v213_v36  ;;  %v215_v38 = vmul.f32 0.25, %v213_v36 }
  0xc9   : > { %222 = vrot.lane.b32.xlu1 %v217_v37, %s603_s3 }
  0xcd   : > { %232 = vrot.lane.b32.xlu1 %v215_v38, %s604_s14 }
 0x137   : > { %v221_v39 = vpop.permute.xlu1 %220  ;;  %v231_v41 = vpop.permute.xlu0 %230 }
 0x138   : > { %v226_v40 = vadd.f32 %v221_v39, %v214_v32 }
 0x13a   : > { %v236_v42 = vadd.f32 %v231_v41, %v226_v40 }
 0x13b   : > { %v223_v43 = vpop.permute.xlu1 %222 }
 0x13c   : > { %v238_v44 = vadd.f32 1e-12, %v236_v42  ;;  %v227_v45 = vadd.f32 %v223_v43, %v215_v38 }
 0x13e   : > { %465 = vrsqrt.f32 %v238_v44  ;;  %vm242_vm5 = vcmp.eq.f32.partialorder %v238_v44, inf  ;;  %v245_v51 = vand.u32 2147483648, %v238_v44  ;;  %vm244_vm7 = vcmp.eq.f32.partialorder %v238_v44, 0.0 }
 0x13f   : > { %v233_v46 = vpop.permute.xlu1 %232 }
 0x140   : > { %v237_v47 = vadd.f32 %v233_v46, %v227_v45 }
 0x142   : > { %v239_v48 = vadd.f32 1e-12, %v237_v47 }
 0x144   : > { %467 = vrsqrt.f32 %v239_v48  ;;  %vm249_vm8 = vcmp.eq.f32.partialorder %v239_v48, inf  ;;  %v252_v56 = vand.u32 2147483648, %v239_v48  ;;  %vm251_vm9 = vcmp.eq.f32.partialorder %v239_v48, 0.0 }
 0x148   : > { %v466_v49 = vpop.eup %465 }
 0x149   : > { %v241_v50 = vmul.f32 %v466_v49, %v238_v44 }
 0x14b   : > { %v243_v52 = vsel %vm242_vm5, %v238_v44, %v241_v50 }
 0x14c   : > { %v246_v53 = vsel %vm244_vm7, %v245_v51, %v243_v52 }
 0x14d   : > { %255 = vst.msk [vmem:[%s152_s26] sm:$0xff] %vm254_vm6, %v246_v53 }
 0x14e   : > { %v468_v54 = vpop.eup %467 }
 0x14f   : > { %v248_v55 = vmul.f32 %v468_v54, %v239_v48 }
 0x151   : > { %v250_v57 = vsel %vm249_vm8, %v239_v48, %v248_v55 }
 0x152   : > { %v253_v58 = vsel %vm251_vm9, %v252_v56, %v250_v57 }
 0x153   : > { %256 = vst.msk [vmem:[%s152_s26 + $0x8] sm:$0xff] %vm254_vm6, %v253_v58 }
 0x154   : > { %512 = shalt.err (!%p509_p3)
}
 0x155   : > { %s513_s21 = scalar_lea.hbm %s762_s15, 256  ;;  %s517_s18 = scalar_lea.hbm %s820_s1, 2048 }
 0x156   : > { %p514_p5 = scmp.ne.s32.totalorder %s762_s15, %s513_s21  ;;  %p518_p2 = scmp.lt.u32.totalorder %s762_s15, %s820_s1 }
 0x157   : > { %p519_p4 = scmp.lt.u32.totalorder %s517_s18, %s513_s21  ;;  %p521_p8 = scmp.lt.u32.totalorder %s513_s21, %s762_s15 }
 0x158   : > { %p515_p6 = pnand %p514_p5, %p827_p9 }
 0x159   : > { %p520_p10 = por %p519_p4, %p518_p2 }
 0x15a   : > { %p516_p7 = pneg %p515_p6 }
 0x15b   : > { %p522_p12 = por %p521_p8, %p520_p10 }
 0x15d   : > { %p523_p0 = pnand %p522_p12, %p516_p7 }
 0x15f   : > { %526 = shalt.err (!%p523_p0)
}
 0x160   : > { %s606_s26 = smov 128   ;;  %s607_s4 = smov 8  }
 0x161   : > { %382 = dma.vmem_to_hbm [thread:$0]  (%p827_p9), %s764_s5, 256, %s762_s15, %s258_s19, %s606_s26, %s606_s26, %s607_s4  }
 0x162 PF: > { %p393_p11 = scmp.ge.s32.totalorder %s597_s13, 2  ;;  %s288_s9 = sand.u32 1, %s569_s6  }
 0x163   : > { %p828_p13 = scmp.ne.s32.totalorder %s825_s25, 0  ;;  %s289_s10 = scalar_lea.sflag [#allocation4], %s288_s9 }
 0x165   : > { %p389_p1 = pnand %p393_p11, %p828_p13 }
 0x167   : > { %564 = dma.done.wait (!%p389_p1), %s289_s10, 256  }
 0x168   : > { %566 = vsyncadd (!%p389_p1), %s289_s10, 4294967040  ;;  %s17_s13 = sadd.s32 1, %s597_s13   ;;  %s829_s6 = smov %s573_s7 }
 0x169   : > { %p14_p3 = scmp.ge.s32.totalorder %s17_s13, 10   ;;  %s830_s7 = smov %s577_s8 }
 0x16a   : > { %s831_s8 = smov %s696_s27  ;;  %s832_s9 = smov %s589_s11 }
 0x16b   : > { %s833_s10 = smov %s593_s12  ;;  %s834_s11 = smov %s837_s16 }
 0x16c   : > { %s835_s12 = smov %s841_s17  ;;  %16 = sbr.rel (!%p14_p3) target bundleno = 7 (0x7), region = 69 }
 0x173   :  { %294 = vsyncpa [#allocation3], 1 }
 0x174   :  { %296 = vsyncpa [#allocation3 + $0x1], 1 }
 0x175   :  { %297 = vsyncpa [#allocation4], 1 }
 0x176   :  { %299 = vsyncpa [#allocation4 + $0x1], 1 }

</bundles_post_ra>
